<compile_context>
chip_gen: v5e
topology: v5e:2x2
jax: 0.10.0
libtpu: 0.0.40
codegen_flags: <defaults>
</compile_context>

<pallas_src>
import functools

import jax
import jax.numpy as jnp
from jax.experimental import pallas as pl
from jax.experimental.pallas import tpu as pltpu


def _scale_kernel(x_ref, o_ref, *, scale):
    # Purely elementwise: f32 compute, store back in the input dtype.
    o_ref[...] = (x_ref[...].astype(jnp.float32) * scale).astype(o_ref.dtype)


def _as_lane_dense_2d(x):
    """Reshape x to 2D with a lane-dense (multiple-of-128) last dim if possible."""
    n = x.size
    # Prefer a wide last dim (multiple of 128) -> unmasked vector stores.
    for w in (8192, 4096, 2048, 1024, 512, 256, 128):
        if n % w == 0:
            return x.reshape(n // w, w)
    # Fallback: natural feature dim.  A full-extent last-dim block is always
    # a legal BlockSpec even when it is not a multiple of 128.
    return x.reshape(-1, x.shape[-1])


def scale_pallas(x, scale):
    """Elementwise x * scale via Pallas (any shape >= 1D, dtype preserved)."""
    orig_shape = x.shape
    x2 = _as_lane_dense_2d(x)
    n_rows, w = x2.shape
    itemsize = jnp.dtype(x2.dtype).itemsize

    # Sublane pack factor: 8 rows (f32), 16 (bf16/f16), 32 (8-bit).
    pack = max(8, 32 // itemsize)

    # VMEM budget for the double-buffered in + out tiles:
    #   2 (in bufs) + 2 (out bufs) = 4 tiles of row_tile * w * itemsize bytes.
    # 32 MiB of tile data leaves headroom on every generation (v7x: 64 MiB).
    tile_budget_bytes = 32 * 1024 * 1024
    max_tile = tile_budget_bytes // (4 * w * itemsize)
    max_tile = max(pack, (max_tile // pack) * pack)
    # >=512 rows already reaches ~85% of HBM roofline (per measured data);
    # cap to keep per-step DMA latency modest.
    max_tile = min(max_tile, 2048)

    if n_rows <= max_tile:
        row_tile = n_rows          # full-extent block: always legal
    else:
        row_tile = max_tile        # multiple of `pack`; tail block is masked

    grid = (pl.cdiv(n_rows, row_tile),)

    out = pl.pallas_call(
        functools.partial(_scale_kernel, scale=float(scale)),
        out_shape=jax.ShapeDtypeStruct((n_rows, w), x.dtype),
        grid_spec=pltpu.PrefetchScalarGridSpec(
            num_scalar_prefetch=0,
            grid=grid,
            in_specs=[pl.BlockSpec((row_tile, w), lambda i: (i, 0))],
            out_specs=pl.BlockSpec((row_tile, w), lambda i: (i, 0)),
        ),
        compiler_params=pltpu.CompilerParams(
            dimension_semantics=("parallel",),
            vmem_limit_bytes=48 * 1024 * 1024,
        ),
    )(x2)

    return out.reshape(orig_shape)


def scale_apply(x, scale, fn, **kwargs):
    """Scale.forward: return fn(x, **kwargs) * scale."""
    # TODO(synk): `fn` is an arbitrary user-supplied submodule in PyTorch; it
    # is applied here as plain JAX (identity in this synthetic example).
    y = fn(x, **kwargs)
    return scale_pallas(y, scale)


if __name__ == "__main__":
    key = jax.random.PRNGKey(0)
    k1, k2 = jax.random.split(key, 2)

    fn = lambda t: t  # placeholder inner module (identity)
    scale = 0.5       # e.g. Conformer's half-step feed-forward scaling

    # Case 1: element count is a multiple of 128 (lane-dense wide path).
    batch, seq, dim = 2, 8, 32
    x1 = jax.random.normal(k1, (batch, seq, dim), dtype=jnp.float32)
    out1 = jax.block_until_ready(scale_apply(x1, scale, fn))
    ref1 = fn(x1) * scale
    assert out1.shape == x1.shape and out1.dtype == x1.dtype
    assert jnp.allclose(out1, ref1, atol=1e-6, rtol=1e-6)

    # Case 2: awkward shape (exercises the fallback full-last-dim layout).
    x2 = jax.random.normal(k2, (2, 7, 24), dtype=jnp.float32)
    out2 = jax.block_until_ready(scale_apply(x2, scale, fn))
    ref2 = fn(x2) * scale
    assert out2.shape == x2.shape and out2.dtype == x2.dtype
    assert jnp.allclose(out2, ref2, atol=1e-6, rtol=1e-6)

    # Case 3: bf16 dtype (exercises sublane pack factor 16 path).
    x3 = jax.random.normal(k1, (4, 16, 64), dtype=jnp.bfloat16)
    out3 = jax.block_until_ready(scale_apply(x3, scale, fn))
    ref3 = (fn(x3).astype(jnp.float32) * scale).astype(jnp.bfloat16)
    assert out3.shape == x3.shape and out3.dtype == x3.dtype
    assert jnp.allclose(out3.astype(jnp.float32), ref3.astype(jnp.float32),
                        atol=1e-2, rtol=1e-2)

    print("KERNEL_OK")
</pallas_src>

<mosaic_0001>
module attributes {stable_mosaic.version = 11 : i64} {
  func.func @_scale_kernel(%arg0: i32, %arg1: memref<1x512xf32, #tpu.memory_space<vmem>>, %arg2: memref<1x512xf32, #tpu.memory_space<vmem>>) attributes {dimension_semantics = [#tpu.dimension_semantics<parallel>], iteration_bounds = array<i64: 1>, scalar_prefetch = 0 : i64, scratch_operands = 0 : i64, tpu.core_type = #tpu.core_type<tc>, window_params = [{transform_indices = @transform_0, window_bounds = array<i64: 1, 512>}, {transform_indices = @transform_1, window_bounds = array<i64: 1, 512>}]} {
    %c0 = arith.constant 0 : index
    %c0_0 = arith.constant 0 : index
    %0 = vector.load %arg1[%c0, %c0_0] : memref<1x512xf32, #tpu.memory_space<vmem>>, vector<1x512xf32>
    %cst = arith.constant 5.000000e-01 : f32
    %1 = vector.broadcast %cst : f32 to vector<1x512xf32>
    %2 = arith.mulf %0, %1 : vector<1x512xf32>
    %c0_1 = arith.constant 0 : index
    %c0_2 = arith.constant 0 : index
    %3 = vector.load %arg2[%c0_1, %c0_2] : memref<1x512xf32, #tpu.memory_space<vmem>>, vector<1x512xf32>
    tpu.vector_store %arg2[%c0_1, %c0_2], %2 {strides = array<i32>} : memref<1x512xf32, #tpu.memory_space<vmem>>, vector<1x512xf32>,
    return
  }
  func.func @transform_0(%arg0: i32) -> (i32, i32) {
    %c0_i32 = arith.constant 0 : i32
    %c0_i32_0 = arith.constant 0 : i32
    return %arg0, %c0_i32 : i32, i32
  }
  func.func @transform_1(%arg0: i32) -> (i32, i32) {
    %c0_i32 = arith.constant 0 : i32
    %c0_i32_0 = arith.constant 0 : i32
    return %arg0, %c0_i32 : i32, i32
  }
}

</mosaic_0001>

<bundles_post_ra>
// kernel: tpu_custom_call.1
= control target key start
LH: loop header
LB: loop body
LE: loop exit
PB: predicated region body
PF: predicated region fallthrough
CT: control target
= control target key end

     0   :  { %6 = vsyncpa [#allocation3], 0  ;;  %s119_s0 = inlined_call_operand.hbm [shape: f32[1,512], index: 0, kind: input, shape index: {}]   ;;  %s120_s1 = inlined_call_operand.hbm [shape: f32[1,512], index: 1, kind: output, shape index: {}]  }
   0x1   :  { %7 = vsyncpa [#allocation4], 0  ;;  %s13_s8 = sshll.u32 %s119_s0, 4  ;;  %s101_s9 = smov [#allocation2]   ;;  %s14_s8 = int_to_ptr.hbm [resolvable:$true] %s13_s8 }
   0x2   :  { %s15_s10 = sshll.u32 %s101_s9, 4  ;;  %s16_s10 = int_to_ptr.vmem [resolvable:$true] %s15_s10 }
   0x3   :  { %18 = dma.hbm_to_vmem [thread:$0]  %s14_s8, 64, %s16_s10, [#allocation3]  }
   0x4   :  { %97 = dma.done.wait [#allocation3], 64  }
   0x5   :  { %98 = vsyncadd [#allocation3], 4294967232  ;;  %v25_v0 = vlaneseq  ;;  %s102_s11 = smov [#allocation5]   ;;  %s37_s15 = sshll.u32 %s120_s1, 4  ;;  %v23_v1 = vld [vmem:[#allocation2] sm:$0xf]  ;;  %s38_s15 = int_to_ptr.hbm [resolvable:$true] %s37_s15 }
   0x6   :  { %s35_s12 = sshll.u32 %s102_s11, 4  ;;  %v24_v2 = vmul.f32 0.5, %v23_v1  ;;  %s36_s12 = int_to_ptr.vmem [resolvable:$true] %s35_s12 }
   0x7   :  { %vm27_vm0 = vcmp.lt.s32.totalorder %v25_v0, 512 }
   0x8   :  { %29 = vst.msk [vmem:[#allocation5] sm:$0xf] %vm27_vm0, %v24_v2 }
   0x9   :  { %40 = dma.vmem_to_hbm [thread:$0]  %s36_s12, 64, %s38_s15, [#allocation4]  }
   0xa   :  { %99 = dma.done.wait [#allocation4], 64  }
   0xb   :  { %100 = vsyncadd [#allocation4], 4294967232 }
   0xc   :  { %45 = vsyncpa [#allocation3], 1 }
   0xd   :  { %46 = vsyncpa [#allocation4], 1 }

</bundles_post_ra>
